<compile_context>
chip_gen: v5e
topology: v5e:2x2
jax: 0.10.0
libtpu: 0.0.40
codegen_flags: <defaults>
</compile_context>

<pallas_src>
import jax
import jax.numpy as jnp
from jax.experimental import pallas as pl
from jax.experimental.pallas import tpu as pltpu

HIDDEN = 128
_SMALL_BATCH_MAX = 4096   # below this: single-shot, no grid
_TILE_B_MAX = 8192        # max batch columns per grid step on the tiled path


def _round_up(n, m):
    return ((n + m - 1) // m) * m


def _critic_kernel(xT_ref, w1_ref, b1_ref, w2_ref, b2_ref, o_ref):
    """Fused critic forward in batch-on-lanes layout (VPU/XLU only, no MXU).

    Per-block shapes:
      xT_ref: (F, TB)        f32, VMEM   (batch on the lane axis)
      w1_ref: (HIDDEN, F)    f32, VMEM   (resident across grid steps)
      b1_ref: (HIDDEN, 1)    f32, VMEM   (resident)
      w2_ref: (HIDDEN, 1)    f32, VMEM   (resident)
      b2_ref: (1,)           f32, SMEM   (scalar)
      o_ref : (1, TB)        f32, VMEM   (lane-dense output slab)
    """
    xT = xT_ref[...]            # (F, TB)
    w1 = w1_ref[...]            # (HIDDEN, F)
    f = xT.shape[0]             # static (4 for CartPole)

    # Layer 1: hT[h, b] = sum_k w1[h, k] * xT[k, b] + b1[h]
    # Each unrolled term is a batch-independent lane-broadcast of a weight
    # column times a stride-0 sublane broadcast of one xT row.
    h = w1[:, 0:1] * xT[0:1, :] + b1_ref[...]          # (HIDDEN, TB)
    for k in range(1, f):                               # static unroll; f tiny
        h = h + w1[:, k:k + 1] * xT[k:k + 1, :]
    h = jnp.maximum(h, 0.0)                             # ReLU (VPU)

    # Layer 2 (HIDDEN -> 1): sublane reduce straight into the lane-dense
    # (1, TB) output; b2 added as an SMEM scalar.
    v = jnp.sum(h * w2_ref[...], axis=0, keepdims=True) + b2_ref[0]
    o_ref[...] = v.astype(o_ref.dtype)


def critic_forward(x, w1, b1, w2, b2):
    """x: (B, F); returns (B, 1) value estimates."""
    B, F = x.shape
    assert w1.shape == (HIDDEN, F)
    assert b1.shape == (HIDDEN, 1)
    assert w2.shape == (HIDDEN, 1)
    assert b2.shape == (1,)

    vmem = pltpu.MemorySpace.VMEM
    smem = pltpu.MemorySpace.SMEM

    xT = x.T                                   # (F, B): batch on lanes
    out_shape = jax.ShapeDtypeStruct((1, B), jnp.float32)

    if B <= _SMALL_BATCH_MAX:
        # Whole problem is a few KiB: no grid, full-array VMEM blocks,
        # b2 as a 1-D SMEM scalar. Fixed launch overhead is the only cost.
        out = pl.pallas_call(
            _critic_kernel,
            out_shape=out_shape,
            in_specs=[
                pl.BlockSpec(memory_space=vmem),   # xT
                pl.BlockSpec(memory_space=vmem),   # w1
                pl.BlockSpec(memory_space=vmem),   # b1
                pl.BlockSpec(memory_space=vmem),   # w2
                pl.BlockSpec(memory_space=smem),   # b2 scalar
            ],
            out_specs=pl.BlockSpec(memory_space=vmem),
        )(xT, w1, b1, w2, b2)
        return out.reshape(B, 1)

    # Large-batch path (vectorized envs / training): tile the lane (batch)
    # axis with big tiles to amortize per-grid-step overhead, but keep at
    # least 2 "parallel" steps so v7x's 2 TensorCores both get work.
    tile_b = min(_TILE_B_MAX, _round_up(pl.cdiv(B, 2), 128))
    grid = (pl.cdiv(B, tile_b),)
    out = pl.pallas_call(
        _critic_kernel,
        out_shape=out_shape,
        grid=grid,
        in_specs=[
            pl.BlockSpec((F, tile_b), lambda i: (0, i)),    # xT tile
            pl.BlockSpec((HIDDEN, F), lambda i: (0, 0)),    # w1 resident
            pl.BlockSpec((HIDDEN, 1), lambda i: (0, 0)),    # b1 resident
            pl.BlockSpec((HIDDEN, 1), lambda i: (0, 0)),    # w2 resident
            pl.BlockSpec(memory_space=smem),                # b2 scalar
        ],
        out_specs=pl.BlockSpec((1, tile_b), lambda i: (0, i)),  # lane-dense
        compiler_params=pltpu.CompilerParams(
            dimension_semantics=("parallel",),
        ),
    )(xT, w1, b1, w2, b2)
    return out.reshape(B, 1)
    # TODO(synk): fuse the actor head into this pallas_call (shared x load,
    # shared fixed overhead) and optionally pre-pack [w1 | b1 | w2] into one
    # (HIDDEN, F+2) operand to cut input DMA descriptors from 4 to 2.


def init_params(key, inputs):
    """Deterministic init mirroring nn.Linear defaults: U(-1/sqrt(fan_in), +)."""
    k1, k2, k3, k4 = jax.random.split(key, 4)
    bound1 = 1.0 / jnp.sqrt(jnp.float32(inputs))
    bound2 = 1.0 / jnp.sqrt(jnp.float32(HIDDEN))
    w1 = jax.random.uniform(k1, (HIDDEN, inputs), jnp.float32, -bound1, bound1)
    b1 = jax.random.uniform(k2, (HIDDEN, 1), jnp.float32, -bound1, bound1)
    w2 = jax.random.uniform(k3, (HIDDEN, 1), jnp.float32, -bound2, bound2)
    b2 = jax.random.uniform(k4, (1,), jnp.float32, -bound2, bound2)
    return w1, b1, w2, b2


def _reference(x, w1, b1, w2, b2):
    h = jnp.maximum(x @ w1.T + b1.T, 0.0)      # (B, HIDDEN)
    return h @ w2 + b2[0]                      # (B, 1)


if __name__ == "__main__":
    key = jax.random.PRNGKey(0)
    k_x, k_p, k_big = jax.random.split(key, 3)

    inputs = 4          # CartPole observation dim
    batch = 8
    x = jax.random.normal(k_x, (batch, inputs), jnp.float32)
    w1, b1, w2, b2 = init_params(k_p, inputs)

    # Small-batch (no-grid) path.
    out = jax.block_until_ready(critic_forward(x, w1, b1, w2, b2))
    ref = _reference(x, w1, b1, w2, b2)
    assert out.shape == (batch, 1)
    assert jnp.allclose(out, ref, atol=1e-4, rtol=1e-4), "small-B mismatch"

    # Large-batch (tiled, >=2 parallel grid steps) path.
    big_b = 8448
    xb = jax.random.normal(k_big, (big_b, inputs), jnp.float32)
    out_b = jax.block_until_ready(critic_forward(xb, w1, b1, w2, b2))
    ref_b = _reference(xb, w1, b1, w2, b2)
    assert out_b.shape == (big_b, 1)
    assert jnp.allclose(out_b, ref_b, atol=1e-4, rtol=1e-4), "large-B mismatch"

    print("KERNEL_OK")
</pallas_src>

<mosaic_0001>
module attributes {stable_mosaic.version = 11 : i64} {
  func.func @_critic_kernel(%arg0: memref<4x8xf32, #tpu.memory_space<vmem>>, %arg1: memref<128x4xf32, #tpu.memory_space<vmem>>, %arg2: memref<128x1xf32, #tpu.memory_space<vmem>>, %arg3: memref<128x1xf32, #tpu.memory_space<vmem>>, %arg4: memref<1xf32, #tpu.memory_space<smem>>, %arg5: memref<1x8xf32, #tpu.memory_space<vmem>>) attributes {dimension_semantics = [], scalar_prefetch = 0 : i64, scratch_operands = 0 : i64, tpu.core_type = #tpu.core_type<tc>} {
    %c0 = arith.constant 0 : index
    %c0_0 = arith.constant 0 : index
    %0 = vector.load %arg0[%c0, %c0_0] : memref<4x8xf32, #tpu.memory_space<vmem>>, vector<4x8xf32>
    %c0_1 = arith.constant 0 : index
    %c0_2 = arith.constant 0 : index
    %1 = vector.load %arg1[%c0_1, %c0_2] : memref<128x4xf32, #tpu.memory_space<vmem>>, vector<128x4xf32>
    %2 = vector.extract_strided_slice %1 {offsets = [0, 0], sizes = [128, 1], strides = [1, 1]} : vector<128x4xf32> to vector<128x1xf32>
    %3 = vector.extract_strided_slice %0 {offsets = [0, 0], sizes = [1, 8], strides = [1, 1]} : vector<4x8xf32> to vector<1x8xf32>
    %4 = vector.broadcast %2 : vector<128x1xf32> to vector<128x8xf32>
    %5 = vector.broadcast %3 : vector<1x8xf32> to vector<128x8xf32>
    %6 = arith.mulf %4, %5 : vector<128x8xf32>
    %c0_3 = arith.constant 0 : index
    %c0_4 = arith.constant 0 : index
    %7 = vector.load %arg2[%c0_3, %c0_4] : memref<128x1xf32, #tpu.memory_space<vmem>>, vector<128x1xf32>
    %8 = vector.broadcast %7 : vector<128x1xf32> to vector<128x8xf32>
    %9 = arith.addf %6, %8 : vector<128x8xf32>
    %10 = vector.extract_strided_slice %1 {offsets = [0, 1], sizes = [128, 1], strides = [1, 1]} : vector<128x4xf32> to vector<128x1xf32>
    %11 = vector.extract_strided_slice %0 {offsets = [1, 0], sizes = [1, 8], strides = [1, 1]} : vector<4x8xf32> to vector<1x8xf32>
    %12 = vector.broadcast %10 : vector<128x1xf32> to vector<128x8xf32>
    %13 = vector.broadcast %11 : vector<1x8xf32> to vector<128x8xf32>
    %14 = arith.mulf %12, %13 : vector<128x8xf32>
    %15 = arith.addf %9, %14 : vector<128x8xf32>
    %16 = vector.extract_strided_slice %1 {offsets = [0, 2], sizes = [128, 1], strides = [1, 1]} : vector<128x4xf32> to vector<128x1xf32>
    %17 = vector.extract_strided_slice %0 {offsets = [2, 0], sizes = [1, 8], strides = [1, 1]} : vector<4x8xf32> to vector<1x8xf32>
    %18 = vector.broadcast %16 : vector<128x1xf32> to vector<128x8xf32>
    %19 = vector.broadcast %17 : vector<1x8xf32> to vector<128x8xf32>
    %20 = arith.mulf %18, %19 : vector<128x8xf32>
    %21 = arith.addf %15, %20 : vector<128x8xf32>
    %22 = vector.extract_strided_slice %1 {offsets = [0, 3], sizes = [128, 1], strides = [1, 1]} : vector<128x4xf32> to vector<128x1xf32>
    %23 = vector.extract_strided_slice %0 {offsets = [3, 0], sizes = [1, 8], strides = [1, 1]} : vector<4x8xf32> to vector<1x8xf32>
    %24 = vector.broadcast %22 : vector<128x1xf32> to vector<128x8xf32>
    %25 = vector.broadcast %23 : vector<1x8xf32> to vector<128x8xf32>
    %26 = arith.mulf %24, %25 : vector<128x8xf32>
    %27 = arith.addf %21, %26 : vector<128x8xf32>
    %cst = arith.constant 0.000000e+00 : f32
    %28 = vector.broadcast %cst : f32 to vector<128x8xf32>
    %29 = arith.maximumf %27, %28 : vector<128x8xf32>
    %c0_5 = arith.constant 0 : index
    %c0_6 = arith.constant 0 : index
    %30 = vector.load %arg3[%c0_5, %c0_6] : memref<128x1xf32, #tpu.memory_space<vmem>>, vector<128x1xf32>
    %31 = vector.broadcast %30 : vector<128x1xf32> to vector<128x8xf32>
    %32 = arith.mulf %29, %31 : vector<128x8xf32>
    %cst_7 = arith.constant dense<0.000000e+00> : vector<8xf32>
    %33 = vector.multi_reduction <add>, %32, %cst_7 [0] : vector<128x8xf32> to vector<8xf32>
    %34 = vector.shape_cast %33 : vector<8xf32> to vector<1x8xf32>
    %c0_8 = arith.constant 0 : index
    %35 = memref.load %arg4[%c0_8] : memref<1xf32, #tpu.memory_space<smem>>
    %36 = vector.broadcast %35 : f32 to vector<1x8xf32>
    %37 = arith.addf %34, %36 : vector<1x8xf32>
    %c0_9 = arith.constant 0 : index
    %c0_10 = arith.constant 0 : index
    %38 = vector.load %arg5[%c0_9, %c0_10] : memref<1x8xf32, #tpu.memory_space<vmem>>, vector<1x8xf32>
    tpu.vector_store %arg5[%c0_9, %c0_10], %37 {strides = array<i32>} : memref<1x8xf32, #tpu.memory_space<vmem>>, vector<1x8xf32>,
    return
  }
}

</mosaic_0001>

<bundles_post_ra>
// kernel: tpu_custom_call.1
= control target key start
LH: loop header
LB: loop body
LE: loop exit
PB: predicated region body
PF: predicated region fallthrough
CT: control target
= control target key end

     0   :  { %v771_v3 = vmov 1   ;;  %v772_v4 = vmov 0   ;;  %s1322_s0 = inlined_call_operand.vmem [shape: f32[4,8], index: 0, kind: input, shape index: {}]   ;;  %s1323_s1 = inlined_call_operand.vmem [shape: f32[128,4], index: 1, kind: input, shape index: {}]   ;;  %s1324_s2 = inlined_call_operand.vmem [shape: f32[128,1], index: 2, kind: input, shape index: {}]   ;;  %s1325_s3 = inlined_call_operand.vmem [shape: f32[128,1], index: 3, kind: input, shape index: {}]   ;;  %s1326_s4 = inlined_call_operand.<no memory space> [shape: f32[1], index: 4, kind: input, shape index: {}]   ;;  %s1327_s5 = inlined_call_operand.hbm [shape: f32[1,8], index: 5, kind: output, shape index: {}]  }
   0x1   :  { %v809_v0 = vld [vmem:[%s1323_s1 + $0x20] sm:$0xff]  ;;  %v814_v1 = vld [vmem:[%s1323_s1 + $0x10] sm:$0xff]  ;;  %v819_v2 = vld [vmem:[%s1323_s1 + $0x8] sm:$0xff]  ;;  %734 = vset.pattern.permute.xlu0 %v771_v3  ;;  %732 = vset.pattern.permute.xlu2 %v772_v4 }
   0x2   :  { %731 = vset.pattern.permute.xlu1 %v772_v4  ;;  %61 = vperm.xlu2 %732, %v809_v0  }
   0x3   :  { %51 = vperm.xlu1 %731, %v814_v1   ;;  %253 = vperm.xlu0 %734, %v819_v2  }
   0x4   :  { %11 = vsyncpa [#allocation4], 0  ;;  %v830_v5 = vld [vmem:[%s1323_s1 + $0x28] sm:$0xff]  ;;  %v835_v6 = vld [vmem:[%s1323_s1 + $0x18] sm:$0xff]  ;;  %v773_v19 = vmov 2   ;;  %v774_v29 = vmov 3  }
   0x5   :  { %v840_v7 = vld [vmem:[%s1323_s1 + $0x30] sm:$0xff]  ;;  %v848_v8 = vld [vmem:[%s1323_s1 + $0x40] sm:$0xff]  ;;  %v853_v9 = vld [vmem:[%s1323_s1 + $0x38] sm:$0xff]  ;;  %vm667_vm0 = vcmask 64512   ;;  %s775_s11 = smov [#allocation3]   ;;  %s717_s15 = sshll.u32 %s1327_s5, 4  ;;  %s718_s15 = int_to_ptr.hbm [resolvable:$true] %s717_s15 }
   0x6   :  { %v858_v10 = vld [vmem:[%s1323_s1 + $0x48] sm:$0xff]  ;;  %v866_v11 = vld [vmem:[%s1323_s1 + $0x58] sm:$0xff]  ;;  %v871_v12 = vld [vmem:[%s1323_s1 + $0x50] sm:$0xff]  ;;  %s715_s12 = sshll.u32 %s775_s11, 4  ;;  %vm708_vm1 = vcmask 57344   ;;  %s716_s12 = int_to_ptr.vmem [resolvable:$true] %s715_s12 }
   0x7   :  { %v876_v13 = vld [vmem:[%s1323_s1 + $0x60] sm:$0xff]  ;;  %v884_v14 = vld [vmem:[%s1323_s1 + $0x70] sm:$0xff]  ;;  %v889_v15 = vld [vmem:[%s1323_s1 + $0x68] sm:$0xff] }
   0x8   :  { %v894_v16 = vld [vmem:[%s1323_s1 + $0x78] sm:$0xff]  ;;  %v137_v17 = vld [vmem:[%s1324_s2 + $0x8] sm:$0xff]  ;;  %v136_v18 = vld [vmem:[%s1324_s2] sm:$0xff] }
   0x9   :  { %v140_v20 = vld [vmem:[%s1324_s2 + $0x20] sm:$0xff]  ;;  %v139_v21 = vld [vmem:[%s1324_s2 + $0x18] sm:$0xff]  ;;  %v142_v23 = vld [vmem:[%s1324_s2 + $0x30] sm:$0xff] }
   0xa   :  { %66 = vperm.xlu2 %732, %v830_v5   ;;  %v143_v22 = vld [vmem:[%s1324_s2 + $0x38] sm:$0xff]  ;;  %v146_v24 = vld [vmem:[%s1324_s2 + $0x50] sm:$0xff]  ;;  %v145_v25 = vld [vmem:[%s1324_s2 + $0x48] sm:$0xff] }
   0xb   :  { %56 = vperm.xlu1 %731, %v835_v6   ;;  %273 = vperm.xlu0 %734, %v840_v7   ;;  %v149_v26 = vld [vmem:[%s1324_s2 + $0x68] sm:$0xff]  ;;  %v148_v27 = vld [vmem:[%s1324_s2 + $0x60] sm:$0xff]  ;;  %v151_v30 = vld [vmem:[%s1324_s2 + $0x78] sm:$0xff] }
   0xc   :  { %v23_v28 = vld [vmem:[%s1323_s1] sm:$0xff]  ;;  %v138_v61 = vld [vmem:[%s1324_s2 + $0x10] sm:$0xff] }
   0xd   :  { %v980_v43 = vld [vmem:[%s1322_s0] sm:$0xf] }
   0xe   :  { %v984_v44 = vperm.slane %v980_v43, 0 }
  0x12   :  { %81 = vperm.xlu2 %732, %v848_v8  }
  0x13   :  { %76 = vperm.xlu1 %731, %v853_v9   ;;  %285 = vperm.xlu0 %734, %v858_v10  }
  0x1a   :  { %96 = vperm.xlu2 %732, %v866_v11  }
  0x1b   :  { %91 = vperm.xlu1 %731, %v871_v12   ;;  %297 = vperm.xlu0 %734, %v876_v13  }
  0x22   :  { %111 = vperm.xlu2 %732, %v884_v14  }
  0x23   :  { %106 = vperm.xlu1 %731, %v889_v15   ;;  %309 = vperm.xlu0 %734, %v894_v16  }
  0x2a   :  { %159 = vperm.xlu2 %732, %v137_v17  }
  0x2b   :  { %154 = vperm.xlu1 %731, %v136_v18   ;;  %738 = vset.pattern.permute.xlu0 %v773_v19  ;;  %v141_v18 = vld [vmem:[%s1324_s2 + $0x28] sm:$0xff] }
  0x2c   :  { %354 = vperm.xlu0 %738, %v814_v1  }
  0x32   :  { %174 = vperm.xlu2 %732, %v140_v20  }
  0x33   :  { %169 = vperm.xlu1 %731, %v139_v21  }
  0x34   :  { %374 = vperm.xlu0 %738, %v853_v9  }
  0x3a   :  { %189 = vperm.xlu2 %732, %v143_v22   ;;  %v1036_v22 = vperm.slane %v980_v43, 1 }
  0x3b   :  { %184 = vperm.xlu1 %731, %v142_v23  }
  0x3c   :  { %386 = vperm.xlu0 %738, %v871_v12  }
  0x42   :  { %204 = vperm.xlu2 %732, %v146_v24  }
  0x43   :  { %199 = vperm.xlu1 %731, %v145_v25  }
  0x44   :  { %398 = vperm.xlu0 %738, %v889_v15  }
  0x4a   :  { %219 = vperm.xlu2 %732, %v149_v26  }
  0x4b   :  { %214 = vperm.xlu1 %731, %v148_v27   ;;  %v147_v27 = vld [vmem:[%s1324_s2 + $0x58] sm:$0xff] }
  0x4c   :  { %739 = vset.pattern.permute.xlu0 %v774_v29 }
  0x4d   :  { %443 = vperm.xlu0 %739, %v23_v28  }
  0x52   :  { %733 = vset.pattern.permute.xlu2 %v771_v3 }
  0x53   :  { %229 = vperm.xlu1 %731, %v151_v30   ;;  %249 = vperm.xlu2 %733, %v23_v28  }
  0x55   :  { %463 = vperm.xlu0 %739, %v830_v5  }
  0x5b   :  { %735 = vset.pattern.permute.xlu1 %v771_v3  ;;  %261 = vperm.xlu2 %733, %v835_v6  }
  0x5c   :  { %257 = vperm.xlu1 %735, %v814_v1   ;;  %v62_v31 = vpop.permute.xlu2 %61 }
  0x5d   :  { %475 = vperm.xlu0 %739, %v848_v8   ;;  %v124_v45 = vmul.f32 %v984_v44, %v62_v31 }
  0x63   :  { %269 = vperm.xlu2 %733, %v830_v5  }
  0x64   :  { %265 = vperm.xlu1 %735, %v809_v0   ;;  %v948_v32 = vpop.permute.xlu2 %66 }
  0x65   :  { %487 = vperm.xlu0 %739, %v866_v11  }
  0x6b   :  { %281 = vperm.xlu2 %733, %v848_v8  }
  0x6c   :  { %277 = vperm.xlu1 %735, %v853_v9   ;;  %v953_v33 = vpop.permute.xlu2 %81 }
  0x6d   :  { %499 = vperm.xlu0 %739, %v884_v14  }
  0x73   :  { %293 = vperm.xlu2 %733, %v866_v11  }
  0x74   :  { %289 = vperm.xlu1 %735, %v871_v12   ;;  %v958_v34 = vpop.permute.xlu2 %96 }
  0x75   :  { %v960_v35 = vpop.permute.xlu1 %51  ;;  %v962_v36 = vpop.permute.xlu0 %253  ;;  %742 = vset.pattern.permute.xlu0 %v772_v4 }
  0x76   :  { %41 = vperm.xlu0 %742, %v23_v28  }
  0x7b   :  { %305 = vperm.xlu2 %733, %v884_v14  }
  0x7c   :  { %301 = vperm.xlu1 %735, %v889_v15   ;;  %v967_v37 = vpop.permute.xlu2 %111 }
  0x7d   :  { %v57_v38 = vpop.permute.xlu1 %56  ;;  %v969_v39 = vpop.permute.xlu0 %273 }
  0x7e   :  { %46 = vperm.xlu0 %742, %v819_v2   ;;  %v123_v62 = vmul.f32 %v984_v44, %v57_v38 }
  0x83   :  { %737 = vset.pattern.permute.xlu2 %v773_v19 }
  0x84   :  { %736 = vset.pattern.permute.xlu1 %v773_v19  ;;  %v972_v40 = vpop.permute.xlu2 %159  ;;  %350 = vperm.xlu2 %737, %v819_v2  }
  0x85   :  { %v77_v41 = vpop.permute.xlu1 %76  ;;  %v975_v42 = vpop.permute.xlu0 %285  ;;  %346 = vperm.xlu1 %736, %v23_v28  }
  0x86   :  { %71 = vperm.xlu0 %742, %v840_v7   ;;  %v127_v50 = vmul.f32 %v984_v44, %v77_v41 }
  0x8c   :  { %v175_v46 = vpop.permute.xlu2 %174  ;;  %362 = vperm.xlu2 %737, %v809_v0  }
  0x8d   :  { %v988_v47 = vadd.f32 %v175_v46, %v124_v45  ;;  %v92_v48 = vpop.permute.xlu1 %91  ;;  %v990_v49 = vpop.permute.xlu0 %297  ;;  %358 = vperm.xlu1 %736, %v835_v6  }
  0x8e   :  { %86 = vperm.xlu0 %742, %v858_v10   ;;  %v130_v55 = vmul.f32 %v984_v44, %v92_v48 }
  0x94   :  { %v190_v51 = vpop.permute.xlu2 %189  ;;  %370 = vperm.xlu2 %737, %v840_v7  }
  0x95   :  { %v996_v52 = vadd.f32 %v190_v51, %v127_v50  ;;  %v107_v53 = vpop.permute.xlu1 %106  ;;  %366 = vperm.xlu1 %736, %v830_v5   ;;  %v999_v54 = vpop.permute.xlu0 %309  ;;  %v564_v50 = vld [vmem:[%s1325_s3 + $0x48] sm:$0xff]  ;;  %v1100_v51 = vperm.slane %v980_v43, 2 }
  0x96   :  { %101 = vperm.xlu0 %742, %v876_v13   ;;  %v133_v60 = vmul.f32 %v984_v44, %v107_v53 }
  0x9c   :  { %v205_v56 = vpop.permute.xlu2 %204  ;;  %382 = vperm.xlu2 %737, %v858_v10  }
  0x9d   :  { %v1004_v57 = vadd.f32 %v205_v56, %v130_v55  ;;  %v1006_v58 = vpop.permute.xlu1 %154  ;;  %378 = vperm.xlu1 %736, %v848_v8  }
  0x9e   :  { %116 = vperm.xlu0 %742, %v894_v16   ;;  %v1010_v59 = vpop.permute.xlu0 %354 }
  0xa4   :  { %v220_v63 = vpop.permute.xlu2 %219  ;;  %394 = vperm.xlu2 %737, %v876_v13  }
  0xa5   :  { %v1018_v3 = vadd.f32 %v220_v63, %v133_v60  ;;  %v170_v5 = vpop.permute.xlu1 %169  ;;  %390 = vperm.xlu1 %736, %v866_v11   ;;  %v144_v11 = vld [vmem:[%s1324_s2 + $0x40] sm:$0xff]  ;;  %v558_v63 = vld [vmem:[%s1325_s3 + $0x18] sm:$0xff] }
  0xa6   :  { %v235_v8 = vadd.f32 %v170_v5, %v123_v62  ;;  %164 = vperm.xlu0 %742, %v138_v61   ;;  %v375_v17 = vpop.permute.xlu0 %374  ;;  %v567_v61 = vld [vmem:[%s1325_s3 + $0x60] sm:$0xff] }
  0xa7   :  { %v417_v56 = vmul.f32 %v1100_v51, %v375_v17 }
  0xac   :  { %406 = vperm.xlu2 %737, %v894_v16  }
  0xad   :  { %v1025_v19 = vpop.permute.xlu1 %184  ;;  %402 = vperm.xlu1 %736, %v884_v14   ;;  %v1028_v20 = vpop.permute.xlu2 %249 }
  0xae   :  { %179 = vperm.xlu0 %742, %v141_v18   ;;  %v1030_v21 = vpop.permute.xlu0 %386 }
  0xb4   :  { %741 = vset.pattern.permute.xlu2 %v774_v29 }
  0xb5   :  { %v1039_v23 = vpop.permute.xlu1 %199  ;;  %740 = vset.pattern.permute.xlu1 %v774_v29  ;;  %451 = vperm.xlu2 %741, %v814_v1   ;;  %v262_v14 = vpop.permute.xlu2 %261 }
  0xb6   :  { %194 = vperm.xlu0 %742, %v144_v11   ;;  %447 = vperm.xlu1 %740, %v819_v2   ;;  %v316_v24 = vmul.f32 %v1036_v22, %v262_v14  ;;  %v1045_v25 = vpop.permute.xlu0 %398  ;;  %v150_v2 = vld [vmem:[%s1324_s2 + $0x70] sm:$0xff]  ;;  %v420_v11 = vmul.f32 %v1100_v51, %v1030_v21  ;;  %v559_v21 = vld [vmem:[%s1325_s3 + $0x20] sm:$0xff] }
  0xb8   :  { %v1047_v26 = vadd.f32 %v316_v24, %v235_v8 }
  0xbd   :  { %v1052_v28 = vpop.permute.xlu1 %214  ;;  %459 = vperm.xlu2 %741, %v809_v0   ;;  %v1055_v29 = vpop.permute.xlu2 %269 }
  0xbe   :  { %209 = vperm.xlu0 %742, %v147_v27   ;;  %455 = vperm.xlu1 %740, %v835_v6   ;;  %v556_v6 = vld [vmem:[%s1325_s3 + $0x8] sm:$0xff] }
  0xbf   :  { %v1058_v1 = vpop.permute.xlu0 %443 }
  0xc5   :  { %v1063_v30 = vpop.permute.xlu1 %229  ;;  %471 = vperm.xlu2 %741, %v853_v9   ;;  %v1066_v31 = vpop.permute.xlu2 %281 }
  0xc6   :  { %224 = vperm.xlu0 %742, %v150_v2   ;;  %467 = vperm.xlu1 %740, %v840_v7   ;;  %v561_v7 = vld [vmem:[%s1325_s3 + $0x30] sm:$0xff] }
  0xc7   :  { %v1069_v0 = vpop.permute.xlu0 %463 }
  0xcd   :  { %483 = vperm.xlu2 %741, %v871_v12   ;;  %v1075_v38 = vpop.permute.xlu2 %293 }
  0xce   :  { %v1077_v41 = vpop.permute.xlu1 %257  ;;  %578 = vperm.xlu0 %742, %v556_v6   ;;  %479 = vperm.xlu1 %740, %v858_v10   ;;  %v570_v6 = vld [vmem:[%s1325_s3 + $0x78] sm:$0xff] }
  0xcf   :  { %v1080_v9 = vpop.permute.xlu0 %475 }
  0xd5   :  { %495 = vperm.xlu2 %741, %v889_v15   ;;  %v1086_v45 = vpop.permute.xlu2 %305  ;;  %v555_v15 = vld [vmem:[%s1325_s3] sm:$0xff] }
  0xd6   :  { %v266_v46 = vpop.permute.xlu1 %265  ;;  %603 = vperm.xlu0 %742, %v561_v7   ;;  %491 = vperm.xlu1 %740, %v876_v13  }
  0xd7   :  { %v317_v12 = vmul.f32 %v1036_v22, %v266_v46  ;;  %v1090_v48 = vpop.permute.xlu0 %487 }
  0xd9   :  { %v333_v10 = vadd.f32 %v317_v12, %v988_v47 }
  0xdd   :  { %743 = vset.pattern.permute.xlu2 %v772_v4 }
  0xde   :  { %v278_v13 = vpop.permute.xlu1 %277  ;;  %618 = vperm.xlu0 %742, %v564_v50   ;;  %503 = vperm.xlu1 %740, %v894_v16   ;;  %v351_v53 = vpop.permute.xlu2 %350  ;;  %v557_v16 = vld [vmem:[%s1325_s3 + $0x10] sm:$0xff]  ;;  %v423_v50 = vmul.f32 %v1100_v51, %v1045_v25  ;;  %v563_v25 = vld [vmem:[%s1325_s3 + $0x40] sm:$0xff] }
  0xdf   :  { %v320_v47 = vmul.f32 %v1036_v22, %v278_v13  ;;  %v1105_v55 = vpop.permute.xlu0 %499  ;;  %573 = vperm.xlu2 %743, %v555_v15  }
  0xe1   :  { %v336_v60 = vadd.f32 %v320_v47, %v996_v52  ;;  %v314_v47 = vmul.f32 %v1036_v22, %v962_v36 }
  0xe3   :  { %v1112_v62 = vadd.f32 %v417_v56, %v336_v60  ;;  %v411_v56 = vmul.f32 %v1100_v51, %v351_v53 }
  0xe6   :  { %v290_v5 = vpop.permute.xlu1 %289  ;;  %633 = vperm.xlu0 %742, %v567_v61   ;;  %744 = vset.pattern.permute.xlu1 %v772_v4  ;;  %v363_v8 = vpop.permute.xlu2 %362  ;;  %v313_v4 = vmul.f32 %v1036_v22, %v1028_v20 }
  0xe7   :  { %v323_v52 = vmul.f32 %v1036_v22, %v290_v5  ;;  %583 = vperm.xlu1 %744, %v557_v16   ;;  %588 = vperm.xlu2 %743, %v558_v63   ;;  %v414_v17 = vmul.f32 %v1100_v51, %v363_v8  ;;  %v562_v16 = vld [vmem:[%s1325_s3 + $0x38] sm:$0xff]  ;;  %v1161_v63 = vperm.slane %v980_v43, 3 }
  0xe8   :  { %v42_v18 = vpop.permute.xlu0 %41 }
  0xe9   :  { %v339_v14 = vadd.f32 %v323_v52, %v1004_v57  ;;  %v1126_v24 = vadd.f32 %v414_v17, %v333_v10  ;;  %v120_v27 = vmul.f32 %v984_v44, %v42_v18  ;;  %v560_v57 = vld [vmem:[%s1325_s3 + $0x28] sm:$0xff]  ;;  %v507_v17 = vmul.f32 %v1161_v63, %v1058_v1 }
  0xeb   :  { %v232_v2 = vadd.f32 %v1006_v58, %v120_v27  ;;  %v1135_v7 = vadd.f32 %v420_v11, %v339_v14  ;;  %v319_v11 = vmul.f32 %v1036_v22, %v969_v39  ;;  %v565_v14 = vld [vmem:[%s1325_s3 + $0x50] sm:$0xff]  ;;  %v566_v27 = vld [vmem:[%s1325_s3 + $0x58] sm:$0xff] }
  0xed   :  { %v329_v46 = vadd.f32 %v313_v4, %v232_v2 }
  0xee   :  { %v302_v12 = vpop.permute.xlu1 %301  ;;  %648 = vperm.xlu0 %742, %v570_v6   ;;  %v371_v20 = vpop.permute.xlu2 %370 }
  0xef   :  { %v326_v58 = vmul.f32 %v1036_v22, %v302_v12  ;;  %593 = vperm.xlu1 %744, %v559_v21   ;;  %598 = vperm.xlu2 %743, %v560_v57   ;;  %v416_v2 = vmul.f32 %v1100_v51, %v371_v20 }
  0xf0   :  { %v47_v10 = vpop.permute.xlu0 %46 }
  0xf1   :  { %v342_v15 = vadd.f32 %v326_v58, %v1018_v3  ;;  %v121_v13 = vmul.f32 %v984_v44, %v47_v10  ;;  %v322_v58 = vmul.f32 %v1036_v22, %v975_v42  ;;  %v568_v10 = vld [vmem:[%s1325_s3 + $0x68] sm:$0xff] }
  0xf3   :  { %v233_v60 = vadd.f32 %v972_v40, %v121_v13  ;;  %v1152_v61 = vadd.f32 %v423_v50, %v342_v15  ;;  %v569_v50 = vld [vmem:[%s1325_s3 + $0x70] sm:$0xff] }
  0xf5   :  { %v330_v3 = vadd.f32 %v314_v47, %v233_v60  ;;  %v325_v60 = vmul.f32 %v1036_v22, %v990_v49 }
  0xf6   :  { %v383_v5 = vpop.permute.xlu2 %382 }
  0xf7   :  { %608 = vperm.xlu1 %744, %v562_v16   ;;  %v347_v36 = vpop.permute.xlu1 %346  ;;  %613 = vperm.xlu2 %743, %v563_v25   ;;  %v1163_v53 = vadd.f32 %v411_v56, %v330_v3  ;;  %v419_v15 = vmul.f32 %v1100_v51, %v383_v5 }
  0xf8   :  { %v410_v40 = vmul.f32 %v1100_v51, %v347_v36  ;;  %v72_v8 = vpop.permute.xlu0 %71 }
  0xf9   :  { %v126_v52 = vmul.f32 %v984_v44, %v72_v8 }
  0xfa   :  { %v426_v18 = vadd.f32 %v410_v40, %v329_v46 }
  0xfb   :  { %v238_v43 = vadd.f32 %v1025_v19, %v126_v52 }
  0xfc   :  { %v1178_v4 = vadd.f32 %v507_v17, %v426_v18  ;;  %v328_v17 = vmul.f32 %v1036_v22, %v999_v54  ;;  %v412_v54 = vmul.f32 %v1100_v51, %v1010_v59  ;;  %v512_v59 = vmul.f32 %v1161_v63, %v1069_v0 }
  0xfd   :  { %v335_v6 = vadd.f32 %v319_v11, %v238_v43  ;;  %v515_v0 = vmul.f32 %v1161_v63, %v1080_v9  ;;  %v518_v9 = vmul.f32 %v1161_v63, %v1090_v48 }
  0xfe   :  { %v395_v1 = vpop.permute.xlu2 %394 }
  0xff   :  { %623 = vperm.xlu1 %744, %v565_v14   ;;  %v359_v21 = vpop.permute.xlu1 %358  ;;  %628 = vperm.xlu2 %743, %v566_v27   ;;  %v1181_v39 = vadd.f32 %v416_v2, %v335_v6  ;;  %v422_v25 = vmul.f32 %v1100_v51, %v395_v1  ;;  %v315_v6 = vmul.f32 %v1036_v22, %v1077_v41 }
 0x100   :  { %v413_v19 = vmul.f32 %v1100_v51, %v359_v21  ;;  %v87_v57 = vpop.permute.xlu0 %86 }
 0x101   :  { %v129_v46 = vmul.f32 %v984_v44, %v87_v57 }
 0x102   :  { %v1186_v12 = vadd.f32 %v413_v19, %v1047_v26  ;;  %v125_v19 = vmul.f32 %v984_v44, %v948_v32 }
 0x103   :  { %v241_v20 = vadd.f32 %v1039_v23, %v129_v46 }
 0x105   :  { %v338_v13 = vadd.f32 %v322_v58, %v241_v20  ;;  %v318_v58 = vmul.f32 %v1036_v22, %v1055_v29  ;;  %v321_v29 = vmul.f32 %v1036_v22, %v1066_v31 }
 0x106   :  { %v407_v47 = vpop.permute.xlu2 %406 }
 0x107   :  { %638 = vperm.xlu1 %744, %v568_v10   ;;  %v367_v26 = vpop.permute.xlu1 %366  ;;  %643 = vperm.xlu2 %743, %v569_v50   ;;  %v1198_v56 = vadd.f32 %v419_v15, %v338_v13  ;;  %v425_v49 = vmul.f32 %v1100_v51, %v407_v47  ;;  %v128_v15 = vmul.f32 %v984_v44, %v953_v33 }
 0x108   :  { %v102_v42 = vpop.permute.xlu0 %101  ;;  %v415_v41 = vmul.f32 %v1100_v51, %v367_v26  ;;  %v131_v33 = vmul.f32 %v984_v44, %v958_v34  ;;  %v134_v34 = vmul.f32 %v984_v44, %v967_v37 }
 0x109   :  { %v132_v23 = vmul.f32 %v984_v44, %v102_v42 }
 0x10b   :  { %v244_v16 = vadd.f32 %v1052_v28, %v132_v23  ;;  %v122_v28 = vmul.f32 %v984_v44, %v960_v35 }
 0x10d   :  { %v341_v3 = vadd.f32 %v325_v60, %v244_v16 }
 0x10f   :  { %v379_v36 = vpop.permute.xlu1 %378  ;;  %v1205_v5 = vpop.permute.xlu2 %451  ;;  %v1207_v40 = vadd.f32 %v422_v25, %v341_v3 }
 0x110   :  { %v117_v8 = vpop.permute.xlu0 %116  ;;  %v418_v26 = vmul.f32 %v1100_v51, %v379_v36 }
 0x111   :  { %v135_v52 = vmul.f32 %v984_v44, %v117_v8  ;;  %v539_v44 = vmax.f32 %v1178_v4, 0.0 }
 0x113   :  { %v247_v18 = vadd.f32 %v1063_v30, %v135_v52  ;;  %v324_v52 = vmul.f32 %v1036_v22, %v1075_v38  ;;  %v327_v38 = vmul.f32 %v1036_v22, %v1086_v45 }
 0x115   :  { %v344_v11 = vadd.f32 %v328_v17, %v247_v18 }
 0x117   :  { %v391_v43 = vpop.permute.xlu1 %390  ;;  %v1216_v14 = vpop.permute.xlu2 %459  ;;  %v1218_v27 = vadd.f32 %v425_v49, %v344_v11 }
 0x118   :  { %v165_v2 = vpop.permute.xlu0 %164  ;;  %v421_v36 = vmul.f32 %v1100_v51, %v391_v43 }
 0x119   :  { %v234_v1 = vadd.f32 %v165_v2, %v122_v28 }
 0x11b   :  { %v331_v30 = vadd.f32 %v315_v6, %v234_v1 }
 0x11d   :  { %v1224_v21 = vadd.f32 %v412_v54, %v331_v30 }
 0x11f   :  { %v403_v35 = vpop.permute.xlu1 %402  ;;  %v1228_v57 = vpop.permute.xlu2 %471 }
 0x120   :  { %v180_v46 = vpop.permute.xlu0 %179  ;;  %v424_v43 = vmul.f32 %v1100_v51, %v403_v35 }
 0x121   :  { %v237_v20 = vadd.f32 %v180_v46, %v125_v19  ;;  %v521_v19 = vmul.f32 %v1161_v63, %v1105_v55  ;;  %v509_v55 = vmul.f32 %v1161_v63, %v1205_v5 }
 0x123   :  { %v334_v10 = vadd.f32 %v318_v58, %v237_v20 }
 0x125   :  { %v431_v50 = vadd.f32 %v415_v41, %v334_v10 }
 0x127   :  { %v1237_v13 = vpop.permute.xlu2 %483  ;;  %v1239_v32 = vadd.f32 %v512_v59, %v431_v50 }
 0x128   :  { %v195_v47 = vpop.permute.xlu0 %194  ;;  %v448_v42 = vpop.permute.xlu1 %447 }
 0x129   :  { %v240_v23 = vadd.f32 %v195_v47, %v128_v15  ;;  %v508_v11 = vmul.f32 %v1161_v63, %v448_v42  ;;  %v525_v47 = vadd.f32 %v509_v55, %v1224_v21  ;;  %v511_v42 = vmul.f32 %v1161_v63, %v1216_v14 }
 0x12a   :  { %v514_v14 = vmul.f32 %v1161_v63, %v1228_v57 }
 0x12b   :  { %v337_v60 = vadd.f32 %v321_v29, %v240_v23  ;;  %v524_v54 = vadd.f32 %v508_v11, %v1163_v53  ;;  %v541_v23 = vmax.f32 %v525_v47, 0.0  ;;  %v527_v5 = vadd.f32 %v511_v42, %v1126_v24 }
 0x12d   :  { %v434_v16 = vadd.f32 %v418_v26, %v337_v60  ;;  %v540_v58 = vmax.f32 %v524_v54, 0.0 }
 0x12f   :  { %v1248_v25 = vadd.f32 %v515_v0, %v434_v16  ;;  %v1252_v31 = vpop.permute.xlu2 %495 }
 0x130   :  { %v210_v3 = vpop.permute.xlu0 %209  ;;  %v456_v8 = vpop.permute.xlu1 %455 }
 0x131   :  { %v243_v17 = vadd.f32 %v210_v3, %v131_v33  ;;  %v510_v4 = vmul.f32 %v1161_v63, %v456_v8 }
 0x133   :  { %v340_v18 = vadd.f32 %v324_v52, %v243_v17  ;;  %v526_v15 = vadd.f32 %v510_v4, %v1186_v12  ;;  %v520_v4 = vmul.f32 %v1161_v63, %v1252_v31 }
 0x135   :  { %v437_v49 = vadd.f32 %v421_v36, %v340_v18  ;;  %v542_v29 = vmax.f32 %v526_v15, 0.0  ;;  %v544_v36 = vmax.f32 %v1239_v32, 0.0  ;;  %v543_v18 = vmax.f32 %v527_v5, 0.0 }
 0x137   :  { %v1260_v28 = vadd.f32 %v518_v9, %v437_v49 }
 0x138   :  { %v225_v2 = vpop.permute.xlu0 %224  ;;  %v468_v6 = vpop.permute.xlu1 %467 }
 0x139   :  { %v246_v1 = vadd.f32 %v225_v2, %v134_v34  ;;  %v574_v48 = vpop.permute.xlu2 %573  ;;  %v513_v0 = vmul.f32 %v1161_v63, %v468_v6  ;;  %v530_v6 = vadd.f32 %v514_v14, %v1112_v62  ;;  %v550_v15 = vmax.f32 %v1260_v28, 0.0 }
 0x13a   :  { %v651_v46 = vmul.f32 %v574_v48, %v539_v44 }
 0x13b   :  { %v343_v30 = vadd.f32 %v327_v38, %v246_v1  ;;  %v529_v12 = vadd.f32 %v513_v0, %v1181_v39 }
 0x13c   :  { %v668_v51 = vsel %vm667_vm0, %v651_v46, 0.0 }
 0x13d   :  { %v440_v37 = vadd.f32 %v424_v43, %v343_v30  ;;  %v545_v34 = vmax.f32 %v529_v12, 0.0  ;;  %v517_v30 = vmul.f32 %v1161_v63, %v1237_v13 }
 0x13f   :  { %v1269_v20 = vadd.f32 %v521_v19, %v440_v37  ;;  %v547_v19 = vmax.f32 %v1248_v25, 0.0  ;;  %v546_v37 = vmax.f32 %v530_v6, 0.0 }
 0x140   :  { %v579_v41 = vpop.permute.xlu0 %578  ;;  %v480_v22 = vpop.permute.xlu1 %479 }
 0x141   :  { %v652_v45 = vmul.f32 %v579_v41, %v540_v58  ;;  %v589_v59 = vpop.permute.xlu2 %588  ;;  %v516_v49 = vmul.f32 %v1161_v63, %v480_v22 }
 0x142   :  { %v654_v16 = vmul.f32 %v589_v59, %v542_v29 }
 0x143   :  { %v669_v53 = vsel %vm667_vm0, %v652_v45, 0.0  ;;  %v532_v54 = vadd.f32 %v516_v49, %v1198_v56  ;;  %v533_v56 = vadd.f32 %v517_v30, %v1135_v7 }
 0x144   :  { %v670_v35 = vadd.f32 %v669_v53, %v668_v51  ;;  %v673_v21 = vsel %vm667_vm0, %v654_v16, 0.0 }
 0x145   :  { %v548_v58 = vmax.f32 %v532_v54, 0.0  ;;  %v549_v47 = vmax.f32 %v533_v56, 0.0 }
 0x148   :  { %v492_v10 = vpop.permute.xlu1 %491  ;;  %v604_v3 = vpop.permute.xlu0 %603 }
 0x149   :  { %v599_v26 = vpop.permute.xlu2 %598  ;;  %v657_v38 = vmul.f32 %v604_v3, %v545_v34  ;;  %v519_v46 = vmul.f32 %v1161_v63, %v492_v10 }
 0x14a   :  { %v656_v11 = vmul.f32 %v599_v26, %v544_v36 }
 0x14b   :  { %v679_v48 = vsel %vm667_vm0, %v657_v38, 0.0  ;;  %v535_v13 = vadd.f32 %v519_v46, %v1207_v40  ;;  %v536_v40 = vadd.f32 %v520_v4, %v1152_v61 }
 0x14c   :  { %v677_v57 = vsel %vm667_vm0, %v656_v11, 0.0 }
 0x150   :  { %v504_v50 = vpop.permute.xlu1 %503  ;;  %v619_v1 = vpop.permute.xlu0 %618 }
 0x151   :  { %v614_v2 = vpop.permute.xlu2 %613  ;;  %v660_v45 = vmul.f32 %v619_v1, %v548_v58  ;;  %v522_v29 = vmul.f32 %v1161_v63, %v504_v50  ;;  %v552_v63 = vmax.f32 %v536_v40, 0.0 }
 0x152   :  { %v659_v41 = vmul.f32 %v614_v2, %v547_v19 }
 0x153   :  { %v685_v10 = vsel %vm667_vm0, %v660_v45, 0.0  ;;  %v538_v31 = vadd.f32 %v522_v29, %v1218_v27 }
 0x154   :  { %v683_v59 = vsel %vm667_vm0, %v659_v41, 0.0 }
 0x158   :  { %v634_v25 = vpop.permute.xlu0 %633 }
 0x159   :  { %v584_v60 = vpop.permute.xlu1 %583  ;;  %v629_v53 = vpop.permute.xlu2 %628 }
 0x15a   :  { %v653_v33 = vmul.f32 %v584_v60, %v541_v23  ;;  %v551_v23 = vmax.f32 %v535_v13, 0.0  ;;  %v662_v26 = vmul.f32 %v629_v53, %v550_v15 }
 0x15c   :  { %v671_v8 = vsel %vm667_vm0, %v653_v33, 0.0  ;;  %v663_v0 = vmul.f32 %v634_v25, %v551_v23  ;;  %v689_v3 = vsel %vm667_vm0, %v662_v26, 0.0 }
 0x15d   :  { %v672_v52 = vadd.f32 %v671_v8, %v670_v35 }
 0x15e   :  { %v691_v8 = vsel %vm667_vm0, %v663_v0, 0.0 }
 0x15f   :  { %v674_v17 = vadd.f32 %v673_v21, %v672_v52  ;;  %v553_v52 = vmax.f32 %v1269_v20, 0.0 }
 0x160   :  { %v649_v50 = vpop.permute.xlu0 %648 }
 0x161   :  { %v594_v9 = vpop.permute.xlu1 %593  ;;  %v644_v5 = vpop.permute.xlu2 %643 }
 0x162   :  { %v655_v24 = vmul.f32 %v594_v9, %v543_v18  ;;  %v665_v61 = vmul.f32 %v644_v5, %v553_v52 }
 0x164   :  { %v675_v39 = vsel %vm667_vm0, %v655_v24, 0.0  ;;  %v695_v27 = vsel %vm667_vm0, %v665_v61, 0.0 }
 0x165   :  { %v676_v43 = vadd.f32 %v675_v39, %v674_v17  ;;  %v554_v17 = vmax.f32 %v538_v31, 0.0  ;;  %v706_v39 = vstv %s1326_s4 }
 0x167   :  { %v678_v32 = vadd.f32 %v677_v57, %v676_v43  ;;  %v666_v36 = vmul.f32 %v649_v50, %v554_v17 }
 0x169   :  { %v609_v44 = vpop.permute.xlu1 %608  ;;  %v680_v62 = vadd.f32 %v679_v48, %v678_v32  ;;  %v697_v34 = vsel %vm667_vm0, %v666_v36, 0.0 }
 0x16a   :  { %v658_v22 = vmul.f32 %v609_v44, %v546_v37 }
 0x16c   :  { %v681_v51 = vsel %vm667_vm0, %v658_v22, 0.0 }
 0x16d   :  { %v682_v35 = vadd.f32 %v681_v51, %v680_v62 }
 0x16f   :  { %v684_v55 = vadd.f32 %v683_v59, %v682_v35 }
 0x171   :  { %v624_v7 = vpop.permute.xlu1 %623  ;;  %v686_v42 = vadd.f32 %v685_v10, %v684_v55 }
 0x172   :  { %v661_v60 = vmul.f32 %v624_v7, %v549_v47 }
 0x174   :  { %v687_v16 = vsel %vm667_vm0, %v661_v60, 0.0 }
 0x175   :  { %v688_v33 = vadd.f32 %v687_v16, %v686_v42 }
 0x177   :  { %v690_v28 = vadd.f32 %v689_v3, %v688_v33 }
 0x179   :  { %v639_v12 = vpop.permute.xlu1 %638  ;;  %v692_v21 = vadd.f32 %v691_v8, %v690_v28 }
 0x17a   :  { %v664_v14 = vmul.f32 %v639_v12, %v552_v63 }
 0x17c   :  { %v693_v18 = vsel %vm667_vm0, %v664_v14, 0.0 }
 0x17d   :  { %v694_v9 = vadd.f32 %v693_v18, %v692_v21 }
 0x17f   :  { %v696_v49 = vadd.f32 %v695_v27, %v694_v9 }
 0x181   :  { %v698_v11 = vadd.f32 %v697_v34, %v696_v49 }
 0x183   :  { %v699_v24 = vrot.slane %v698_v11, 4 }
 0x185   :  { %v700_v2 = vadd.f32 %v699_v24, %v698_v11 }
 0x187   :  { %v701_v20 = vrot.slane %v700_v2, 2 }
 0x189   :  { %v702_v6 = vadd.f32 %v701_v20, %v700_v2 }
 0x18b   :  { %v703_v38 = vrot.slane %v702_v6, 1 }
 0x18d   :  { %v704_v1 = vadd.f32 %v703_v38, %v702_v6 }
 0x18f   :  { %v707_v43 = vadd.f32 %v706_v39, %v704_v1 }
 0x191   :  { %709 = vst.msk [vmem:[#allocation3] sm:$0x1] %vm708_vm1, %v707_v43 }
 0x192   :  { %720 = dma.vmem_to_hbm [thread:$0]  %s716_s12, 16, %s718_s15, [#allocation4]  }
 0x193   :  { %769 = dma.done.wait [#allocation4], 16  }
 0x194   :  { %770 = vsyncadd [#allocation4], 4294967280 }
 0x195   :  { %725 = vsyncpa [#allocation4], 1 }

</bundles_post_ra>
